<compile_context>
chip_gen: v5e
topology: v5e:2x2
jax: 0.10.0
libtpu: 0.0.40
codegen_flags: <defaults>
</compile_context>

<pallas_src>
import jax
import jax.numpy as jnp
import numpy as np
from jax.experimental import pallas as pl
from jax.experimental.pallas import tpu as pltpu

WIDTH = 5000        # hardcoded in the PyTorch module
WIDTH_PAD = 5120    # next multiple of 128 (lane-aligned)


def _mlp_kernel(x_ref, w1_ref, b1_ref, w2_ref, b2_ref, o_ref):
    # layer1 on the MXU: bf16 x bf16 operands, f32 accumulation.
    h = jnp.dot(x_ref[...], w1_ref[...], preferred_element_type=jnp.float32)
    # f32 epilogue: bias + ReLU on the VPU.
    h = jnp.maximum(h + b1_ref[...], 0.0)
    # predict layer (out_features = 1): VPU multiply + XLU lane reduction
    # instead of an N=1 MXU matmul.
    y = jnp.sum(h * w2_ref[...], axis=-1, keepdims=True)
    o_ref[...] = (y + b2_ref[...]).astype(o_ref.dtype)


def prepare_params(w1_t, b1, w2_t, b2):
    """One-time param prep: zero-pad WIDTH->WIDTH_PAD (lane-dense) and cast the
    streamed layer-1 weight to bf16. The padded tail is all zeros, so it
    contributes exactly 0 through ReLU and the final reduction."""
    pad = WIDTH_PAD - WIDTH
    w1_p = jnp.pad(w1_t, ((0, 0), (0, pad))).astype(jnp.bfloat16)   # (F, 5120) bf16
    b1_p = jnp.pad(b1, (0, pad)).reshape(1, WIDTH_PAD).astype(jnp.float32)
    w2_p = jnp.pad(w2_t.reshape(-1), (0, pad)).reshape(1, WIDTH_PAD).astype(jnp.float32)
    b2_p = b2.reshape(1, 1).astype(jnp.float32)
    return w1_p, b1_p, w2_p, b2_p


def net_forward(x, w1_p, b1_p, w2_p, b2_p):
    B, F = x.shape
    x_bf = x.astype(jnp.bfloat16)

    flops = 2 * B * F * WIDTH_PAD + 4 * B * WIDTH_PAD
    bytes_accessed = (x_bf.size * 2 + w1_p.size * 2 + b1_p.size * 4
                      + w2_p.size * 4 + b2_p.size * 4 + B * 1 * 4)

    vmem = pl.BlockSpec(memory_space=pltpu.MemorySpace.VMEM)
    return pl.pallas_call(
        _mlp_kernel,
        out_shape=jax.ShapeDtypeStruct((B, 1), jnp.float32),
        in_specs=[vmem, vmem, vmem, vmem, vmem],
        out_specs=vmem,
        cost_estimate=pl.CostEstimate(
            flops=flops, transcendentals=0, bytes_accessed=bytes_accessed),
    )(x_bf, w1_p, b1_p, w2_p, b2_p)


def init_params(key, n_feature):
    """Deterministic init mirroring the PyTorch module.

    kaiming_uniform_(mode='fan_in', a=0) -> U(-sqrt(6/fan_in), sqrt(6/fan_in))
    Linear bias default -> U(-1/sqrt(fan_in), 1/sqrt(fan_in))
    Weights are stored pre-transposed as (in, out).
    """
    k1, k2, k3, k4 = jax.random.split(key, 4)

    bound1 = float(np.sqrt(6.0 / n_feature))
    w1_t = jax.random.uniform(k1, (n_feature, WIDTH), jnp.float32,
                              minval=-bound1, maxval=bound1)
    bb1 = 1.0 / float(np.sqrt(n_feature))
    b1 = jax.random.uniform(k2, (WIDTH,), jnp.float32, minval=-bb1, maxval=bb1)

    bound2 = float(np.sqrt(6.0 / WIDTH))
    w2_t = jax.random.uniform(k3, (WIDTH, 1), jnp.float32,
                              minval=-bound2, maxval=bound2)
    bb2 = 1.0 / float(np.sqrt(WIDTH))
    b2 = jax.random.uniform(k4, (1,), jnp.float32, minval=-bb2, maxval=bb2)

    return w1_t, b1, w2_t, b2


if __name__ == "__main__":
    key = jax.random.PRNGKey(0)
    kx, kp = jax.random.split(key)

    B, n_feature = 2, 32
    x = jax.random.normal(kx, (B, n_feature), jnp.float32)
    w1_t, b1, w2_t, b2 = init_params(kp, n_feature)
    w1_p, b1_p, w2_p, b2_p = prepare_params(w1_t, b1, w2_t, b2)

    out = jax.block_until_ready(net_forward(x, w1_p, b1_p, w2_p, b2_p))
    assert out.shape == (B, 1)

    # Reference 1 (tight): same bf16-cast / padded math in pure JAX.
    x_bf = x.astype(jnp.bfloat16)
    h_ref = jnp.maximum(
        jnp.dot(x_bf, w1_p, preferred_element_type=jnp.float32) + b1_p, 0.0)
    ref_bf = jnp.sum(h_ref * w2_p, axis=-1, keepdims=True) + b2_p
    np.testing.assert_allclose(np.asarray(out), np.asarray(ref_bf),
                               rtol=1e-4, atol=1e-4)

    # Reference 2 (loose): full-f32 PyTorch-equivalent forward; tolerance is
    # relaxed because layer-1 operands are streamed as bf16 in the kernel.
    ref_f32 = jnp.maximum(x @ w1_t + b1[None, :], 0.0) @ w2_t + b2[None, :]
    np.testing.assert_allclose(np.asarray(out), np.asarray(ref_f32),
                               rtol=5e-2, atol=5e-2)

    print("KERNEL_OK")
</pallas_src>

<mosaic_0001>
module attributes {stable_mosaic.version = 11 : i64} {
  func.func @_mlp_kernel(%arg0: memref<2x32xbf16, #tpu.memory_space<vmem>>, %arg1: memref<32x5120xbf16, #tpu.memory_space<vmem>>, %arg2: memref<1x5120xf32, #tpu.memory_space<vmem>>, %arg3: memref<1x5120xf32, #tpu.memory_space<vmem>>, %arg4: memref<1x1xf32, #tpu.memory_space<vmem>>, %arg5: memref<2x1xf32, #tpu.memory_space<vmem>>) attributes {dimension_semantics = [], scalar_prefetch = 0 : i64, scratch_operands = 0 : i64, tpu.core_type = #tpu.core_type<tc>} {
    %c0 = arith.constant 0 : index
    %c0_0 = arith.constant 0 : index
    %0 = vector.load %arg0[%c0, %c0_0] : memref<2x32xbf16, #tpu.memory_space<vmem>>, vector<2x32xbf16>
    %c0_1 = arith.constant 0 : index
    %c0_2 = arith.constant 0 : index
    %1 = vector.load %arg1[%c0_1, %c0_2] : memref<32x5120xbf16, #tpu.memory_space<vmem>>, vector<32x5120xbf16>
    %cst = arith.constant dense<0.000000e+00> : vector<2x5120xf32>
    %2 = tpu.matmul %0, %1, %cst {dimension_numbers = #tpu.dot_dimension_numbers<[1], [0], [0], [1], [0, 0, 1, 1], [], []>} : vector<2x32xbf16>, vector<32x5120xbf16>, vector<2x5120xf32> -> vector<2x5120xf32>
    %c0_3 = arith.constant 0 : index
    %c0_4 = arith.constant 0 : index
    %3 = vector.load %arg2[%c0_3, %c0_4] : memref<1x5120xf32, #tpu.memory_space<vmem>>, vector<1x5120xf32>
    %4 = vector.broadcast %3 : vector<1x5120xf32> to vector<2x5120xf32>
    %5 = arith.addf %2, %4 : vector<2x5120xf32>
    %cst_5 = arith.constant 0.000000e+00 : f32
    %6 = vector.broadcast %cst_5 : f32 to vector<2x5120xf32>
    %7 = arith.maximumf %5, %6 : vector<2x5120xf32>
    %c0_6 = arith.constant 0 : index
    %c0_7 = arith.constant 0 : index
    %8 = vector.load %arg3[%c0_6, %c0_7] : memref<1x5120xf32, #tpu.memory_space<vmem>>, vector<1x5120xf32>
    %9 = vector.broadcast %8 : vector<1x5120xf32> to vector<2x5120xf32>
    %10 = arith.mulf %7, %9 : vector<2x5120xf32>
    %cst_8 = arith.constant dense<0.000000e+00> : vector<2xf32>
    %11 = vector.multi_reduction <add>, %10, %cst_8 [1] : vector<2x5120xf32> to vector<2xf32>
    %12 = vector.shape_cast %11 : vector<2xf32> to vector<2x1xf32>
    %c0_9 = arith.constant 0 : index
    %c0_10 = arith.constant 0 : index
    %13 = vector.load %arg4[%c0_9, %c0_10] : memref<1x1xf32, #tpu.memory_space<vmem>>, vector<1x1xf32>
    %14 = vector.broadcast %13 : vector<1x1xf32> to vector<2x1xf32>
    %15 = arith.addf %12, %14 : vector<2x1xf32>
    %c0_11 = arith.constant 0 : index
    %c0_12 = arith.constant 0 : index
    %16 = vector.load %arg5[%c0_11, %c0_12] : memref<2x1xf32, #tpu.memory_space<vmem>>, vector<2x1xf32>
    tpu.vector_store %arg5[%c0_11, %c0_12], %15 {strides = array<i32>} : memref<2x1xf32, #tpu.memory_space<vmem>>, vector<2x1xf32>,
    return
  }
}

</mosaic_0001>

<bundles_post_ra>
// kernel: tpu_custom_call.1
= control target key start
LH: loop header
LB: loop body
LE: loop exit
PB: predicated region body
PF: predicated region fallthrough
CT: control target
= control target key end

     0   :  { %s2213_s0 = inlined_call_operand.vmem [shape: bf16[2,32], index: 0, kind: input, shape index: {}]   ;;  %s2214_s1 = inlined_call_operand.hbm [shape: bf16[32,5120], index: 1, kind: input, shape index: {}]   ;;  %s2215_s2 = inlined_call_operand.hbm [shape: f32[1,5120], index: 2, kind: input, shape index: {}]   ;;  %s2216_s3 = inlined_call_operand.hbm [shape: f32[1,5120], index: 3, kind: input, shape index: {}]   ;;  %s2217_s4 = inlined_call_operand.<no memory space> [shape: f32[1,1], index: 4, kind: input, shape index: {}]   ;;  %s2218_s5 = inlined_call_operand.vmem [shape: f32[2,1], index: 5, kind: output, shape index: {}]  }
   0x1   :  { %v10_v0 = vstv %s2217_s4 }
   0x2   :  { %11 = vst [vmem:[#allocation2] sm:$0x1] %v10_v0 }
   0x3   :  { %12 = vsyncpa [#allocation4], 0 }
   0x4   :  { %13 = vsyncpa [#allocation6], 0  ;;  %s34_s22 = sshll.u32 %s2215_s2, 4  ;;  %s1948_s23 = smov [#allocation5]   ;;  %s35_s22 = int_to_ptr.hbm [resolvable:$true] %s34_s22 }
   0x5   :  { %s36_s24 = sshll.u32 %s1948_s23, 4  ;;  %s20_s27 = sshll.u32 %s2214_s1, 4  ;;  %s37_s24 = int_to_ptr.vmem [resolvable:$true] %s36_s24  ;;  %s21_s27 = int_to_ptr.hbm [resolvable:$true] %s20_s27 }
   0x6   :  { %39 = dma.hbm_to_vmem [thread:$0]  %s35_s22, 640, %s37_s24, [#allocation6]  }
   0x7   :  { %s1949_s28 = smov [#allocation3]   ;;  %s1950_s4 = smov 2560  }
   0x8   :  { %s22_s29 = sshll.u32 %s1949_s28, 4  ;;  %s1951_s30 = smov 160   ;;  %s23_s29 = int_to_ptr.vmem [resolvable:$true] %s22_s29 }
   0x9   :  { %28 = dma.hbm_to_vmem [thread:$0]  %s21_s27, 10240, %s23_s29, [#allocation4], %s1950_s4, %s1950_s4, %s1951_s30  }
   0xa   :  { %s45_s2 = sshll.u32 %s2216_s3, 4  ;;  %s1952_s8 = smov [#allocation7]   ;;  %s46_s2 = int_to_ptr.hbm [resolvable:$true] %s45_s2 }
   0xb   :  { %s47_s9 = sshll.u32 %s1952_s8, 4  ;;  %s48_s9 = int_to_ptr.vmem [resolvable:$true] %s47_s9 }
   0xc   :  { %50 = dma.hbm_to_vmem [thread:$0]  %s46_s2, 640, %s48_s9, [#allocation6]  }
   0xd   :  { %1944 = dma.done.wait [#allocation4], 10240  }
   0xe   :  { %1945 = vsyncadd [#allocation4], 4294957056 }
   0xf   :  { %1946 = dma.done.wait [#allocation6], 1280  }
  0x10   :  { %1947 = vsyncadd [#allocation6], 4294966016  ;;  %vm637_vm0 = vcmask 261120   ;;  %v1588_v1 = vld [vmem:[#allocation3 + $0x140] sm:$0xf]  ;;  %vm1331_vm1 = vcmask 1041408  }
  0x11   :  { %v1846_v2 = vld [vmem:[#allocation3 + $0x1dc] sm:$0xf0]  ;;  %v1826_v3 = vld [vmem:[#allocation3 + $0x144] sm:$0xf]  ;;  %v1596_v6 = vld [vmem:[#allocation3 + $0x148] sm:$0xf] }
  0x12   :  { %v1589_v4 = vor.u32 %v1846_v2, %v1588_v1  ;;  %v1590_v5 = vld [vmem:[#allocation3 + $0x1e0] sm:$0xf0]  ;;  %v1847_v7 = vld [vmem:[#allocation3 + $0x1e4] sm:$0xf0]  ;;  %v1827_v10 = vld [vmem:[#allocation3 + $0x14c] sm:$0xf] }
  0x13   :  { %v1593_v8 = vor.u32 %v1826_v3, %v1590_v5  ;;  %v1597_v9 = vor.u32 %v1847_v7, %v1596_v6  ;;  %v1598_v11 = vld [vmem:[#allocation3 + $0x1e8] sm:$0xf0]  ;;  %v1428_v12 = vld [vmem:[#allocation3] sm:$0xf]  ;;  %v1786_v15 = vld [vmem:[#allocation3 + $0x4] sm:$0xf] }
  0x14   :  { %647 = vmatpush.bf16.msra.mxu0 %v1589_v4  ;;  %v1601_v13 = vor.u32 %v1827_v10, %v1598_v11  ;;  %v1806_v14 = vld [vmem:[#allocation3 + $0x9c] sm:$0xf0]  ;;  %v1430_v16 = vld [vmem:[#allocation3 + $0xa0] sm:$0xf0]  ;;  %v1436_v19 = vld [vmem:[#allocation3 + $0x8] sm:$0xf] }
  0x15   :  { %660 = vmatpush.bf16.msra.mxu1 %v1593_v8  ;;  %673 = vmatpush.bf16.msra.mxu2 %v1597_v9  ;;  %v1429_v17 = vor.u32 %v1806_v14, %v1428_v12  ;;  %v1433_v18 = vor.u32 %v1786_v15, %v1430_v16  ;;  %v1807_v20 = vld [vmem:[#allocation3 + $0xa4] sm:$0xf0]  ;;  %v1787_v21 = vld [vmem:[#allocation3 + $0xc] sm:$0xf]  ;;  %v1998_v24 = vld [vmem:[%s2213_s0] sm:$0x1] }
  0x16   :  { %686 = vmatpush.bf16.msra.mxu3 %v1601_v13  ;;  %v1437_v22 = vor.u32 %v1807_v20, %v1436_v19  ;;  %v1438_v23 = vld [vmem:[#allocation3 + $0xa8] sm:$0xf0]  ;;  %v1612_v25 = vld [vmem:[#allocation3 + $0x158] sm:$0xf]  ;;  %v1604_v28 = vld [vmem:[#allocation3 + $0x150] sm:$0xf] }
  0x17   :  { %v1441_v26 = vor.u32 %v1787_v21, %v1438_v23  ;;  %v1849_v27 = vld [vmem:[#allocation3 + $0x1f4] sm:$0xf0]  ;;  %v1848_v29 = vld [vmem:[#allocation3 + $0x1ec] sm:$0xf0]  ;;  %v1829_v31 = vld [vmem:[#allocation3 + $0x15c] sm:$0xf] }
  0x18   :  { %648 = vmatpush.bf16.msra.mxu0 %v1429_v17  ;;  %v1613_v30 = vor.u32 %v1849_v27, %v1612_v25  ;;  %v1614_v32 = vld [vmem:[#allocation3 + $0x1f8] sm:$0xf0]  ;;  %v1828_v33 = vld [vmem:[#allocation3 + $0x154] sm:$0xf]  ;;  %v1605_v34 = vor.u32 %v1848_v29, %v1604_v28  ;;  %v1452_v37 = vld [vmem:[#allocation3 + $0x18] sm:$0xf] }
  0x19   :  { %661 = vmatpush.bf16.msra.mxu1 %v1433_v18  ;;  %674 = vmatpush.bf16.msra.mxu2 %v1437_v22  ;;  %v1617_v35 = vor.u32 %v1829_v31, %v1614_v32  ;;  %v1606_v36 = vld [vmem:[#allocation3 + $0x1f0] sm:$0xf0]  ;;  %v1809_v38 = vld [vmem:[#allocation3 + $0xb4] sm:$0xf0]  ;;  %v1444_v41 = vld [vmem:[#allocation3 + $0x10] sm:$0xf] }
  0x1a   :  { %687 = vmatpush.bf16.msra.mxu3 %v1441_v26  ;;  %v1609_v39 = vor.u32 %v1828_v33, %v1606_v36  ;;  %v1453_v40 = vor.u32 %v1809_v38, %v1452_v37  ;;  %v1808_v42 = vld [vmem:[#allocation3 + $0xac] sm:$0xf0]  ;;  %v1789_v43 = vld [vmem:[#allocation3 + $0x1c] sm:$0xf]  ;;  %v1788_v45 = vld [vmem:[#allocation3 + $0x14] sm:$0xf] }
  0x1b   :  { %1746 = vmatmul.msk.bf16.vlgmr.msra.gmra.mxu0 %vm637_vm0, %v1998_v24  ;;  %v1454_v44 = vld [vmem:[#allocation3 + $0xb8] sm:$0xf0]  ;;  %v1446_v46 = vld [vmem:[#allocation3 + $0xb0] sm:$0xf0]  ;;  %v1628_v48 = vld [vmem:[#allocation3 + $0x168] sm:$0xf]  ;;  %v1445_v51 = vor.u32 %v1808_v42, %v1444_v41 }
  0x1c   :  { %1747 = vmatmul.msk.bf16.vlgmr.msra.gmra.mxu1 %vm637_vm0, %v1998_v24  ;;  %1748 = vmatmul.msk.bf16.vlgmr.msra.gmra.mxu2 %vm637_vm0, %v1998_v24  ;;  %v1457_v47 = vor.u32 %v1789_v43, %v1454_v44  ;;  %v1851_v49 = vld [vmem:[#allocation3 + $0x204] sm:$0xf0]  ;;  %v1620_v50 = vld [vmem:[#allocation3 + $0x160] sm:$0xf]  ;;  %v1831_v54 = vld [vmem:[#allocation3 + $0x16c] sm:$0xf]  ;;  %v1449_v56 = vor.u32 %v1788_v45, %v1446_v46 }
  0x1d   :  { %725 = vmatpush.bf16.msrb.mxu2 %v1613_v30  ;;  %1749 = vmatmul.msk.bf16.vlgmr.msra.gmra.mxu3 %vm637_vm0, %v1998_v24  ;;  %v1629_v52 = vor.u32 %v1851_v49, %v1628_v48  ;;  %v1850_v53 = vld [vmem:[#allocation3 + $0x1fc] sm:$0xf0]  ;;  %v1630_v55 = vld [vmem:[#allocation3 + $0x208] sm:$0xf0]  ;;  %v1830_v59 = vld [vmem:[#allocation3 + $0x164] sm:$0xf] }
  0x1e   :  { %738 = vmatpush.bf16.msrb.mxu3 %v1617_v35  ;;  %699 = vmatpush.bf16.msrb.mxu0 %v1605_v34  ;;  %v1621_v57 = vor.u32 %v1850_v53, %v1620_v50  ;;  %v1633_v58 = vor.u32 %v1831_v54, %v1630_v55  ;;  %v1622_v60 = vld [vmem:[#allocation3 + $0x200] sm:$0xf0]  ;;  %v1468_v61 = vld [vmem:[#allocation3 + $0x28] sm:$0xf]  ;;  %v1460_v0 = vld [vmem:[#allocation3 + $0x20] sm:$0xf] }
  0x1f   :  { %712 = vmatpush.bf16.msrb.mxu1 %v1609_v39  ;;  %v1625_v62 = vor.u32 %v1830_v59, %v1622_v60  ;;  %v1811_v63 = vld [vmem:[#allocation3 + $0xc4] sm:$0xf0]  ;;  %v1810_v1 = vld [vmem:[#allocation3 + $0xbc] sm:$0xf0]  ;;  %v1791_v3 = vld [vmem:[#allocation3 + $0x2c] sm:$0xf] }
  0x20   :  { %v1469_v2 = vor.u32 %v1811_v63, %v1468_v61  ;;  %v1470_v4 = vld [vmem:[#allocation3 + $0xc8] sm:$0xf0]  ;;  %v1790_v5 = vld [vmem:[#allocation3 + $0x24] sm:$0xf]  ;;  %v1461_v8 = vor.u32 %v1810_v1, %v1460_v0  ;;  %v1644_v10 = vld [vmem:[#allocation3 + $0x178] sm:$0xf] }
  0x21   :  { %726 = vmatpush.bf16.msrb.mxu2 %v1453_v40  ;;  %v1473_v6 = vor.u32 %v1791_v3, %v1470_v4  ;;  %v1462_v7 = vld [vmem:[#allocation3 + $0xc0] sm:$0xf0]  ;;  %v1853_v11 = vld [vmem:[#allocation3 + $0x214] sm:$0xf0]  ;;  %v1636_v12 = vld [vmem:[#allocation3 + $0x170] sm:$0xf] }
  0x22   :  { %739 = vmatpush.bf16.msrb.mxu3 %v1457_v47  ;;  %700 = vmatpush.bf16.msrb.mxu0 %v1445_v51  ;;  %v1465_v9 = vor.u32 %v1790_v5, %v1462_v7  ;;  %v1852_v13 = vld [vmem:[#allocation3 + $0x20c] sm:$0xf0]  ;;  %v1833_v14 = vld [vmem:[#allocation3 + $0x17c] sm:$0xf]  ;;  %v1832_v16 = vld [vmem:[#allocation3 + $0x174] sm:$0xf]  ;;  %v1645_v18 = vor.u32 %v1853_v11, %v1644_v10 }
  0x23   :  { %713 = vmatpush.bf16.msrb.mxu1 %v1449_v56  ;;  %v1646_v15 = vld [vmem:[#allocation3 + $0x218] sm:$0xf0]  ;;  %v1638_v17 = vld [vmem:[#allocation3 + $0x210] sm:$0xf0]  ;;  %v1637_v19 = vor.u32 %v1852_v13, %v1636_v12  ;;  %v1484_v21 = vld [vmem:[#allocation3 + $0x38] sm:$0xf] }
  0x24   :  { %v1649_v20 = vor.u32 %v1833_v14, %v1646_v15  ;;  %v1813_v22 = vld [vmem:[#allocation3 + $0xd4] sm:$0xf0]  ;;  %v1476_v23 = vld [vmem:[#allocation3 + $0x30] sm:$0xf]  ;;  %v1641_v25 = vor.u32 %v1832_v16, %v1638_v17  ;;  %v1793_v27 = vld [vmem:[#allocation3 + $0x3c] sm:$0xf] }
  0x25   :  { %777 = vmatpush.bf16.msra.mxu2 %v1629_v52  ;;  %v1812_v26 = vld [vmem:[#allocation3 + $0xcc] sm:$0xf0]  ;;  %v1486_v28 = vld [vmem:[#allocation3 + $0xd8] sm:$0xf0]  ;;  %v1792_v29 = vld [vmem:[#allocation3 + $0x34] sm:$0xf]  ;;  %v1485_v31 = vor.u32 %v1813_v22, %v1484_v21 }
  0x26   :  { %790 = vmatpush.bf16.msra.mxu3 %v1633_v58  ;;  %751 = vmatpush.bf16.msra.mxu0 %v1621_v57  ;;  %v1478_v30 = vld [vmem:[#allocation3 + $0xd0] sm:$0xf0]  ;;  %v1477_v32 = vor.u32 %v1812_v26, %v1476_v23  ;;  %v1489_v33 = vor.u32 %v1793_v27, %v1486_v28  ;;  %v1660_v35 = vld [vmem:[#allocation3 + $0x188] sm:$0xf]  ;;  %v1652_v37 = vld [vmem:[#allocation3 + $0x180] sm:$0xf] }
  0x27   :  { %764 = vmatpush.bf16.msra.mxu1 %v1625_v62  ;;  %v1481_v34 = vor.u32 %v1792_v29, %v1478_v30  ;;  %v1855_v36 = vld [vmem:[#allocation3 + $0x224] sm:$0xf0]  ;;  %v1854_v38 = vld [vmem:[#allocation3 + $0x21c] sm:$0xf0]  ;;  %v1835_v39 = vld [vmem:[#allocation3 + $0x18c] sm:$0xf] }
  0x28   :  { %v1662_v40 = vld [vmem:[#allocation3 + $0x228] sm:$0xf0]  ;;  %v1834_v41 = vld [vmem:[#allocation3 + $0x184] sm:$0xf]  ;;  %v1661_v43 = vor.u32 %v1855_v36, %v1660_v35  ;;  %v1653_v44 = vor.u32 %v1854_v38, %v1652_v37  ;;  %v1500_v46 = vld [vmem:[#allocation3 + $0x48] sm:$0xf] }
  0x29   :  { %778 = vmatpush.bf16.msra.mxu2 %v1469_v2  ;;  %v1654_v42 = vld [vmem:[#allocation3 + $0x220] sm:$0xf0]  ;;  %v1665_v45 = vor.u32 %v1835_v39, %v1662_v40  ;;  %v1815_v47 = vld [vmem:[#allocation3 + $0xe4] sm:$0xf0]  ;;  %v1492_v48 = vld [vmem:[#allocation3 + $0x40] sm:$0xf] }
  0x2a   :  { %791 = vmatpush.bf16.msra.mxu3 %v1473_v6  ;;  %752 = vmatpush.bf16.msra.mxu0 %v1461_v8  ;;  %v1657_v49 = vor.u32 %v1834_v41, %v1654_v42  ;;  %v1814_v50 = vld [vmem:[#allocation3 + $0xdc] sm:$0xf0]  ;;  %v1795_v51 = vld [vmem:[#allocation3 + $0x4c] sm:$0xf]  ;;  %v1794_v53 = vld [vmem:[#allocation3 + $0x44] sm:$0xf]  ;;  %v1501_v55 = vor.u32 %v1815_v47, %v1500_v46 }
  0x2b   :  { %765 = vmatpush.bf16.msra.mxu1 %v1465_v9  ;;  %1750 = vmatmul.msk.bf16.vlgmr.msrb.gmra.mxu0 %vm637_vm0, %v1998_v24  ;;  %v1502_v52 = vld [vmem:[#allocation3 + $0xe8] sm:$0xf0]  ;;  %v1494_v54 = vld [vmem:[#allocation3 + $0xe0] sm:$0xf0]  ;;  %v1493_v56 = vor.u32 %v1814_v50, %v1492_v48  ;;  %v1676_v59 = vld [vmem:[#allocation3 + $0x198] sm:$0xf] }
  0x2c   :  { %1751 = vmatmul.msk.bf16.vlgmr.msrb.gmra.mxu1 %vm637_vm0, %v1998_v24  ;;  %1752 = vmatmul.msk.bf16.vlgmr.msrb.gmra.mxu2 %vm637_vm0, %v1998_v24  ;;  %v1505_v57 = vor.u32 %v1795_v51, %v1502_v52  ;;  %v1497_v58 = vor.u32 %v1794_v53, %v1494_v54  ;;  %v1857_v60 = vld [vmem:[#allocation3 + $0x234] sm:$0xf0]  ;;  %v1668_v61 = vld [vmem:[#allocation3 + $0x190] sm:$0xf]  ;;  %v1837_v63 = vld [vmem:[#allocation3 + $0x19c] sm:$0xf] }
  0x2d   :  { %1753 = vmatmul.msk.bf16.vlgmr.msrb.gmra.mxu3 %vm637_vm0, %v1998_v24  ;;  %829 = vmatpush.bf16.msrb.mxu2 %v1645_v18  ;;  %v1856_v62 = vld [vmem:[#allocation3 + $0x22c] sm:$0xf0]  ;;  %v1678_v0 = vld [vmem:[#allocation3 + $0x238] sm:$0xf0]  ;;  %v1836_v1 = vld [vmem:[#allocation3 + $0x194] sm:$0xf]  ;;  %v1677_v3 = vor.u32 %v1857_v60, %v1676_v59 }
  0x2e   :  { %803 = vmatpush.bf16.msrb.mxu0 %v1637_v19  ;;  %842 = vmatpush.bf16.msrb.mxu3 %v1649_v20  ;;  %v1670_v2 = vld [vmem:[#allocation3 + $0x230] sm:$0xf0]  ;;  %v1669_v4 = vor.u32 %v1856_v62, %v1668_v61  ;;  %v1681_v5 = vor.u32 %v1837_v63, %v1678_v0  ;;  %v1516_v6 = vld [vmem:[#allocation3 + $0x58] sm:$0xf]  ;;  %v1508_v8 = vld [vmem:[#allocation3 + $0x50] sm:$0xf] }
  0x2f   :  { %816 = vmatpush.bf16.msrb.mxu1 %v1641_v25  ;;  %v1817_v7 = vld [vmem:[#allocation3 + $0xf4] sm:$0xf0]  ;;  %v1673_v9 = vor.u32 %v1836_v1, %v1670_v2  ;;  %v1816_v10 = vld [vmem:[#allocation3 + $0xec] sm:$0xf0]  ;;  %v1797_v11 = vld [vmem:[#allocation3 + $0x5c] sm:$0xf] }
  0x30   :  { %v1518_v12 = vld [vmem:[#allocation3 + $0xf8] sm:$0xf0]  ;;  %v1796_v13 = vld [vmem:[#allocation3 + $0x54] sm:$0xf]  ;;  %v1517_v15 = vor.u32 %v1817_v7, %v1516_v6  ;;  %v1509_v16 = vor.u32 %v1816_v10, %v1508_v8  ;;  %v1692_v19 = vld [vmem:[#allocation3 + $0x1a8] sm:$0xf] }
  0x31   :  { %830 = vmatpush.bf16.msrb.mxu2 %v1485_v31  ;;  %v1510_v14 = vld [vmem:[#allocation3 + $0xf0] sm:$0xf0]  ;;  %v1521_v17 = vor.u32 %v1797_v11, %v1518_v12  ;;  %v1859_v20 = vld [vmem:[#allocation3 + $0x244] sm:$0xf0]  ;;  %v1684_v21 = vld [vmem:[#allocation3 + $0x1a0] sm:$0xf] }
  0x32   :  { %804 = vmatpush.bf16.msrb.mxu0 %v1477_v32  ;;  %843 = vmatpush.bf16.msrb.mxu3 %v1489_v33  ;;  %v1513_v18 = vor.u32 %v1796_v13, %v1510_v14  ;;  %v1858_v22 = vld [vmem:[#allocation3 + $0x23c] sm:$0xf0]  ;;  %v1839_v23 = vld [vmem:[#allocation3 + $0x1ac] sm:$0xf]  ;;  %v1838_v26 = vld [vmem:[#allocation3 + $0x1a4] sm:$0xf]  ;;  %v1693_v28 = vor.u32 %v1859_v20, %v1692_v19 }
  0x33   :  { %817 = vmatpush.bf16.msrb.mxu1 %v1481_v34  ;;  %v1694_v25 = vld [vmem:[#allocation3 + $0x248] sm:$0xf0]  ;;  %v1686_v27 = vld [vmem:[#allocation3 + $0x240] sm:$0xf0]  ;;  %v1685_v29 = vor.u32 %v1858_v22, %v1684_v21  ;;  %v1532_v31 = vld [vmem:[#allocation3 + $0x68] sm:$0xf] }
  0x34   :  { %v1697_v30 = vor.u32 %v1839_v23, %v1694_v25  ;;  %v1819_v32 = vld [vmem:[#allocation3 + $0x104] sm:$0xf0]  ;;  %v1524_v33 = vld [vmem:[#allocation3 + $0x60] sm:$0xf]  ;;  %v1689_v34 = vor.u32 %v1838_v26, %v1686_v27  ;;  %v1799_v36 = vld [vmem:[#allocation3 + $0x6c] sm:$0xf] }
  0x35   :  { %v1818_v35 = vld [vmem:[#allocation3 + $0xfc] sm:$0xf0]  ;;  %v1534_v37 = vld [vmem:[#allocation3 + $0x108] sm:$0xf0]  ;;  %v1798_v38 = vld [vmem:[#allocation3 + $0x64] sm:$0xf]  ;;  %v1533_v40 = vor.u32 %v1819_v32, %v1532_v31 }
  0x36   :  { %v1526_v39 = vld [vmem:[#allocation3 + $0x100] sm:$0xf0]  ;;  %v1525_v41 = vor.u32 %v1818_v35, %v1524_v33  ;;  %v1537_v42 = vor.u32 %v1799_v36, %v1534_v37  ;;  %v1700_v46 = vld [vmem:[#allocation3 + $0x1b0] sm:$0xf]  ;;  %v1841_v48 = vld [vmem:[#allocation3 + $0x1bc] sm:$0xf] }
  0x37   :  { %v1860_v47 = vld [vmem:[#allocation3 + $0x24c] sm:$0xf0]  ;;  %v1840_v50 = vld [vmem:[#allocation3 + $0x1b4] sm:$0xf]  ;;  %v1801_v60 = vld [vmem:[#allocation3 + $0x7c] sm:$0xf] }
  0x38   :  { %v1702_v51 = vld [vmem:[#allocation3 + $0x250] sm:$0xf0]  ;;  %v1701_v53 = vor.u32 %v1860_v47, %v1700_v46  ;;  %v1820_v59 = vld [vmem:[#allocation3 + $0x10c] sm:$0xf0]  ;;  %v1550_v61 = vld [vmem:[#allocation3 + $0x118] sm:$0xf0] }
  0x39   :  { %v1800_v62 = vld [vmem:[#allocation3 + $0x74] sm:$0xf]  ;;  %v1553_v2 = vor.u32 %v1801_v60, %v1550_v61  ;;  %v1716_v6 = vld [vmem:[#allocation3 + $0x1c0] sm:$0xf]  ;;  %v1843_v8 = vld [vmem:[#allocation3 + $0x1cc] sm:$0xf] }
  0x3a   :  { %v1542_v63 = vld [vmem:[#allocation3 + $0x110] sm:$0xf0]  ;;  %v1862_v7 = vld [vmem:[#allocation3 + $0x25c] sm:$0xf0]  ;;  %v1842_v10 = vld [vmem:[#allocation3 + $0x1c4] sm:$0xf] }
  0x3b   :  { %1754 = vmatmul.msk.bf16.vlgmr.msra.gmra.mxu0 %vm637_vm0, %v1998_v24  ;;  %v1718_v11 = vld [vmem:[#allocation3 + $0x260] sm:$0xf0]  ;;  %v1717_v13 = vor.u32 %v1862_v7, %v1716_v6  ;;  %v1822_v19 = vld [vmem:[#allocation3 + $0x11c] sm:$0xf0]  ;;  %v1803_v20 = vld [vmem:[#allocation3 + $0x8c] sm:$0xf] }
  0x3c   :  { %1755 = vmatmul.msk.bf16.vlgmr.msra.gmra.mxu1 %vm637_vm0, %v1998_v24  ;;  %1756 = vmatmul.msk.bf16.vlgmr.msra.gmra.mxu2 %vm637_vm0, %v1998_v24  ;;  %v1566_v21 = vld [vmem:[#allocation3 + $0x128] sm:$0xf0]  ;;  %v1802_v22 = vld [vmem:[#allocation3 + $0x84] sm:$0xf]  ;;  %v1732_v31 = vld [vmem:[#allocation3 + $0x1d0] sm:$0xf] }
  0x3d   :  { %1757 = vmatmul.msk.bf16.vlgmr.msra.gmra.mxu3 %vm637_vm0, %v1998_v24  ;;  %881 = vmatpush.bf16.msra.mxu2 %v1661_v43  ;;  %v1529_v43 = vor.u32 %v1798_v38, %v1526_v39  ;;  %v1558_v23 = vld [vmem:[#allocation3 + $0x120] sm:$0xf0]  ;;  %v1569_v27 = vor.u32 %v1803_v20, %v1566_v21  ;;  %v1864_v32 = vld [vmem:[#allocation3 + $0x26c] sm:$0xf0]  ;;  %v1845_v33 = vld [vmem:[#allocation3 + $0x1dc] sm:$0xf] }
  0x3e   :  { %855 = vmatpush.bf16.msra.mxu0 %v1653_v44  ;;  %894 = vmatpush.bf16.msra.mxu3 %v1665_v45  ;;  %v1708_v44 = vld [vmem:[#allocation3 + $0x1b8] sm:$0xf]  ;;  %v1844_v35 = vld [vmem:[#allocation3 + $0x1d4] sm:$0xf]  ;;  %v1733_v38 = vor.u32 %v1864_v32, %v1732_v31  ;;  %v1582_v46 = vld [vmem:[#allocation3 + $0x138] sm:$0xf0] }
  0x3f   :  { %868 = vmatpush.bf16.msra.mxu1 %v1657_v49  ;;  %v1861_v45 = vld [vmem:[#allocation3 + $0x254] sm:$0xf0]  ;;  %v1710_v49 = vld [vmem:[#allocation3 + $0x258] sm:$0xf0]  ;;  %v1734_v36 = vld [vmem:[#allocation3 + $0x270] sm:$0xf0] }
  0x40   :  { %v1709_v52 = vor.u32 %v1861_v45, %v1708_v44  ;;  %v1713_v54 = vor.u32 %v1841_v48, %v1710_v49  ;;  %v1824_v44 = vld [vmem:[#allocation3 + $0x12c] sm:$0xf0]  ;;  %v1805_v45 = vld [vmem:[#allocation3 + $0x9c] sm:$0xf]  ;;  %v1804_v47 = vld [vmem:[#allocation3 + $0x94] sm:$0xf] }
  0x41   :  { %882 = vmatpush.bf16.msra.mxu2 %v1501_v55  ;;  %v1548_v55 = vld [vmem:[#allocation3 + $0x78] sm:$0xf]  ;;  %v1574_v48 = vld [vmem:[#allocation3 + $0x130] sm:$0xf0]  ;;  %vm1418_vm2 = vcmask 1024  }
  0x42   :  { %856 = vmatpush.bf16.msra.mxu0 %v1493_v56  ;;  %895 = vmatpush.bf16.msra.mxu3 %v1505_v57  ;;  %v1821_v56 = vld [vmem:[#allocation3 + $0x114] sm:$0xf0]  ;;  %v1540_v57 = vld [vmem:[#allocation3 + $0x70] sm:$0xf] }
  0x43   :  { %869 = vmatpush.bf16.msra.mxu1 %v1497_v58  ;;  %v1705_v58 = vor.u32 %v1840_v50, %v1702_v51  ;;  %v1549_v0 = vor.u32 %v1821_v56, %v1548_v55  ;;  %v1541_v1 = vor.u32 %v1820_v59, %v1540_v57  ;;  %v1585_v51 = vor.u32 %v1805_v45, %v1582_v46  ;;  %v2067_v55 = vld [vmem:[#allocation7] sm:$0xff] }
  0x44   :  { %v1211_v59 = vperm.slane %v2067_v55, 0  ;;  %v1215_v31 = vperm.slane %v2067_v55, 4  ;;  %v1217_v46 = vperm.slane %v2067_v55, 6 }
  0x4b   :  { %1758 = vmatmul.msk.bf16.vlgmr.msrb.gmra.mxu0 %vm637_vm0, %v1998_v24 }
  0x4c   :  { %1759 = vmatmul.msk.bf16.vlgmr.msrb.gmra.mxu1 %vm637_vm0, %v1998_v24  ;;  %1760 = vmatmul.msk.bf16.vlgmr.msrb.gmra.mxu2 %vm637_vm0, %v1998_v24 }
  0x4d   :  { %1761 = vmatmul.msk.bf16.vlgmr.msrb.gmra.mxu3 %vm637_vm0, %v1998_v24  ;;  %933 = vmatpush.bf16.msrb.mxu2 %v1677_v3  ;;  %v1545_v3 = vor.u32 %v1800_v62, %v1542_v63  ;;  %v1212_v62 = vperm.slane %v2067_v55, 1 }
  0x4e   :  { %907 = vmatpush.bf16.msrb.mxu0 %v1669_v4  ;;  %946 = vmatpush.bf16.msrb.mxu3 %v1681_v5  ;;  %v1724_v4 = vld [vmem:[#allocation3 + $0x1c8] sm:$0xf] }
  0x4f   :  { %920 = vmatpush.bf16.msrb.mxu1 %v1673_v9  ;;  %v1863_v5 = vld [vmem:[#allocation3 + $0x264] sm:$0xf0]  ;;  %v1726_v9 = vld [vmem:[#allocation3 + $0x268] sm:$0xf0] }
  0x50   :  { %v1725_v12 = vor.u32 %v1863_v5, %v1724_v4  ;;  %v1729_v14 = vor.u32 %v1843_v8, %v1726_v9  ;;  %v1213_v9 = vperm.slane %v2067_v55, 2 }
  0x51   :  { %934 = vmatpush.bf16.msrb.mxu2 %v1517_v15  ;;  %v1564_v15 = vld [vmem:[#allocation3 + $0x88] sm:$0xf] }
  0x52   :  { %908 = vmatpush.bf16.msrb.mxu0 %v1509_v16  ;;  %947 = vmatpush.bf16.msrb.mxu3 %v1521_v17  ;;  %v1823_v16 = vld [vmem:[#allocation3 + $0x124] sm:$0xf0]  ;;  %v1556_v17 = vld [vmem:[#allocation3 + $0x80] sm:$0xf] }
  0x53   :  { %921 = vmatpush.bf16.msrb.mxu1 %v1513_v18  ;;  %v1721_v18 = vor.u32 %v1842_v10, %v1718_v11  ;;  %v1565_v25 = vor.u32 %v1823_v16, %v1564_v15  ;;  %v1557_v26 = vor.u32 %v1822_v19, %v1556_v17 }
  0x5b   :  { %1762 = vmatmul.msk.bf16.vlgmr.msra.gmra.mxu0 %vm637_vm0, %v1998_v24 }
  0x5c   :  { %1763 = vmatmul.msk.bf16.vlgmr.msra.gmra.mxu1 %vm637_vm0, %v1998_v24  ;;  %1764 = vmatmul.msk.bf16.vlgmr.msra.gmra.mxu2 %vm637_vm0, %v1998_v24 }
  0x5d   :  { %1765 = vmatmul.msk.bf16.vlgmr.msra.gmra.mxu3 %vm637_vm0, %v1998_v24  ;;  %985 = vmatpush.bf16.msra.mxu2 %v1693_v28  ;;  %v1561_v28 = vor.u32 %v1802_v22, %v1558_v23 }
  0x5e   :  { %959 = vmatpush.bf16.msra.mxu0 %v1685_v29  ;;  %998 = vmatpush.bf16.msra.mxu3 %v1697_v30  ;;  %v1740_v29 = vld [vmem:[#allocation3 + $0x1d8] sm:$0xf] }
  0x5f   :  { %972 = vmatpush.bf16.msra.mxu1 %v1689_v34  ;;  %v1865_v30 = vld [vmem:[#allocation3 + $0x274] sm:$0xf0]  ;;  %v1742_v34 = vld [vmem:[#allocation3 + $0x278] sm:$0xf0] }
  0x60   :  { %v1741_v37 = vor.u32 %v1865_v30, %v1740_v29  ;;  %v1745_v39 = vor.u32 %v1845_v33, %v1742_v34  ;;  %v1216_v34 = vperm.slane %v2067_v55, 5 }
  0x61   :  { %986 = vmatpush.bf16.msra.mxu2 %v1533_v40  ;;  %v1580_v40 = vld [vmem:[#allocation3 + $0x98] sm:$0xf] }
  0x62   :  { %960 = vmatpush.bf16.msra.mxu0 %v1525_v41  ;;  %999 = vmatpush.bf16.msra.mxu3 %v1537_v42  ;;  %v1825_v41 = vld [vmem:[#allocation3 + $0x134] sm:$0xf0]  ;;  %v1572_v42 = vld [vmem:[#allocation3 + $0x90] sm:$0xf] }
  0x63   :  { %973 = vmatpush.bf16.msra.mxu1 %v1529_v43  ;;  %v1737_v43 = vor.u32 %v1844_v35, %v1734_v36  ;;  %v1581_v49 = vor.u32 %v1825_v41, %v1580_v40  ;;  %v1573_v50 = vor.u32 %v1824_v44, %v1572_v42 }
  0x6b   :  { %1766 = vmatmul.msk.bf16.vlgmr.msrb.gmra.mxu0 %vm637_vm0, %v1998_v24 }
  0x6c   :  { %1767 = vmatmul.msk.bf16.vlgmr.msrb.gmra.mxu1 %vm637_vm0, %v1998_v24  ;;  %1768 = vmatmul.msk.bf16.vlgmr.msrb.gmra.mxu2 %vm637_vm0, %v1998_v24 }
  0x6d   :  { %1769 = vmatmul.msk.bf16.vlgmr.msrb.gmra.mxu3 %vm637_vm0, %v1998_v24  ;;  %1037 = vmatpush.bf16.msrb.mxu2 %v1709_v52  ;;  %v1577_v52 = vor.u32 %v1804_v47, %v1574_v48 }
  0x6e   :  { %1011 = vmatpush.bf16.msrb.mxu0 %v1701_v53  ;;  %1050 = vmatpush.bf16.msrb.mxu3 %v1713_v54  ;;  %v2064_v53 = vld [vmem:[#allocation5] sm:$0xff] }
  0x6f   :  { %1024 = vmatpush.bf16.msrb.mxu1 %v1705_v58  ;;  %v157_v54 = vperm.slane %v2064_v53, 0  ;;  %v158_v56 = vperm.slane %v2064_v53, 1  ;;  %v161_v20 = vperm.slane %v2064_v53, 4  ;;  %v162_v22 = vperm.slane %v2064_v53, 5 }
  0x71   :  { %1038 = vmatpush.bf16.msrb.mxu2 %v1549_v0 }
  0x72   :  { %1012 = vmatpush.bf16.msrb.mxu0 %v1541_v1  ;;  %1051 = vmatpush.bf16.msrb.mxu3 %v1553_v2  ;;  %v159_v1 = vperm.slane %v2064_v53, 2 }
  0x73   :  { %1025 = vmatpush.bf16.msrb.mxu1 %v1545_v3  ;;  %v160_v3 = vperm.slane %v2064_v53, 3 }
  0x7b   :  { %1770 = vmatmul.msk.bf16.vlgmr.msra.gmra.mxu0 %vm637_vm0, %v1998_v24 }
  0x7c   :  { %1771 = vmatmul.msk.bf16.vlgmr.msra.gmra.mxu1 %vm637_vm0, %v1998_v24  ;;  %1772 = vmatmul.msk.bf16.vlgmr.msra.gmra.mxu2 %vm637_vm0, %v1998_v24 }
  0x7d   :  { %1773 = vmatmul.msk.bf16.vlgmr.msra.gmra.mxu3 %vm637_vm0, %v1998_v24  ;;  %1089 = vmatpush.bf16.msra.mxu2 %v1725_v12 }
  0x7e   :  { %1063 = vmatpush.bf16.msra.mxu0 %v1717_v13  ;;  %1102 = vmatpush.bf16.msra.mxu3 %v1729_v14  ;;  %v1214_v14 = vperm.slane %v2067_v55, 3 }
  0x7f   :  { %1076 = vmatpush.bf16.msra.mxu1 %v1721_v18 }
  0x81   :  { %1090 = vmatpush.bf16.msra.mxu2 %v1565_v25 }
  0x82   :  { %1064 = vmatpush.bf16.msra.mxu0 %v1557_v26  ;;  %1103 = vmatpush.bf16.msra.mxu3 %v1569_v27 }
  0x83   :  { %1077 = vmatpush.bf16.msra.mxu1 %v1561_v28 }
  0x8b   :  { %1774 = vmatmul.msk.bf16.vlgmr.msrb.gmra.mxu0 %vm637_vm0, %v1998_v24 }
  0x8c   :  { %1775 = vmatmul.msk.bf16.vlgmr.msrb.gmra.mxu1 %vm637_vm0, %v1998_v24  ;;  %1776 = vmatmul.msk.bf16.vlgmr.msrb.gmra.mxu2 %vm637_vm0, %v1998_v24 }
  0x8d   :  { %1777 = vmatmul.msk.bf16.vlgmr.msrb.gmra.mxu3 %vm637_vm0, %v1998_v24  ;;  %1141 = vmatpush.bf16.msrb.mxu2 %v1741_v37  ;;  %v163_v37 = vperm.slane %v2064_v53, 6 }
  0x8e   :  { %1115 = vmatpush.bf16.msrb.mxu0 %v1733_v38  ;;  %1154 = vmatpush.bf16.msrb.mxu3 %v1745_v39  ;;  %v164_v39 = vperm.slane %v2064_v53, 7 }
  0x8f   :  { %1128 = vmatpush.bf16.msrb.mxu1 %v1737_v43 }
  0x91   :  { %1142 = vmatpush.bf16.msrb.mxu2 %v1581_v49 }
  0x92   :  { %1116 = vmatpush.bf16.msrb.mxu0 %v1573_v50  ;;  %1155 = vmatpush.bf16.msrb.mxu3 %v1585_v51  ;;  %v1218_v50 = vperm.slane %v2067_v55, 7 }
  0x93   :  { %1129 = vmatpush.bf16.msrb.mxu1 %v1577_v52 }
  0x98   :  { %v650_v57 = vpop.f32.mrf.mxu0 }
  0x99   :  { %v651_v58 = vadd.f32 %v650_v57, %v157_v54  ;;  %v663_v60 = vpop.f32.mrf.mxu1 }
  0x9a   :  { %v664_v61 = vadd.f32 %v663_v60, %v158_v56 }
  0x9b   :  { %v1161_v63 = vmax.f32 %v651_v58, 0.0  ;;  %1778 = vmatmul.msk.bf16.vlgmr.msra.gmra.mxu0 %vm637_vm0, %v1998_v24 }
  0x9c   :  { %v1162_v0 = vmax.f32 %v664_v61, 0.0  ;;  %1779 = vmatmul.msk.bf16.vlgmr.msra.gmra.mxu1 %vm637_vm0, %v1998_v24  ;;  %1780 = vmatmul.msk.bf16.vlgmr.msra.gmra.mxu2 %vm637_vm0, %v1998_v24 }
  0x9d   :  { %v1291_v2 = vmul.f32 %v1211_v59, %v1161_v63  ;;  %1781 = vmatmul.msk.bf16.vlgmr.msra.gmra.mxu3 %vm637_vm0, %v1998_v24 }
  0x9e   :  { %v1292_v4 = vmul.f32 %v1212_v62, %v1162_v0 }
  0x9f   :  { %v1332_v5 = vsel %vm1331_vm1, %v1291_v2, 0.0  ;;  %v676_v6 = vpop.f32.mrf.mxu2 }
  0xa0   :  { %v1333_v7 = vsel %vm1331_vm1, %v1292_v4, 0.0  ;;  %v677_v8 = vadd.f32 %v676_v6, %v159_v1  ;;  %v689_v10 = vpop.f32.mrf.mxu3  ;;  %v652_v11 = vpop.f32.mrf.mxu0  ;;  %v148_v4 = vld [vmem:[#allocation5 + $0x8] sm:$0xff] }
  0xa1   :  { %v1334_v12 = vadd.f32 %v1333_v7, %v1332_v5  ;;  %v690_v13 = vadd.f32 %v689_v10, %v160_v3  ;;  %v665_v15 = vpop.f32.mrf.mxu1  ;;  %v166_v11 = vperm.slane %v148_v4, 1 }
  0xa2   :  { %v1163_v16 = vmax.f32 %v677_v8, 0.0 }
  0xa3   :  { %v1164_v17 = vmax.f32 %v690_v13, 0.0 }
  0xa4   :  { %v1293_v18 = vmul.f32 %v1213_v9, %v1163_v16  ;;  %v165_v9 = vperm.slane %v148_v4, 0 }
  0xa5   :  { %v1294_v19 = vmul.f32 %v1214_v14, %v1164_v17  ;;  %v167_v14 = vperm.slane %v148_v4, 2 }
  0xa6   :  { %v1335_v21 = vsel %vm1331_vm1, %v1293_v18, 0.0 }
  0xa7   :  { %v1336_v23 = vadd.f32 %v1335_v21, %v1334_v12  ;;  %v1337_v25 = vsel %vm1331_vm1, %v1294_v19, 0.0  ;;  %v678_v26 = vpop.f32.mrf.mxu2  ;;  %v2108_v12 = vld [vmem:[#allocation7 + $0x8] sm:$0xff] }
  0xa8   :  { %v691_v27 = vpop.f32.mrf.mxu3  ;;  %v702_v28 = vpop.f32.mrf.mxu0  ;;  %v1219_v19 = vperm.slane %v2108_v12, 0  ;;  %v1220_v26 = vperm.slane %v2108_v12, 1 }
  0xa9   :  { %v1338_v29 = vadd.f32 %v1337_v25, %v1336_v23  ;;  %v703_v30 = vadd.f32 %v702_v28, %v161_v20  ;;  %v715_v32 = vpop.f32.mrf.mxu1  ;;  %v169_v27 = vperm.slane %v148_v4, 4 }
  0xaa   :  { %v716_v33 = vadd.f32 %v715_v32, %v162_v22  ;;  %v168_v22 = vperm.slane %v148_v4, 3 }
  0xab   :  { %v1165_v35 = vmax.f32 %v703_v30, 0.0  ;;  %1782 = vmatmul.msk.bf16.vlgmr.msrb.gmra.mxu0 %vm637_vm0, %v1998_v24  ;;  %v1221_v30 = vperm.slane %v2108_v12, 2 }
  0xac   :  { %v1166_v36 = vmax.f32 %v716_v33, 0.0  ;;  %1783 = vmatmul.msk.bf16.vlgmr.msrb.gmra.mxu1 %vm637_vm0, %v1998_v24  ;;  %1784 = vmatmul.msk.bf16.vlgmr.msrb.gmra.mxu2 %vm637_vm0, %v1998_v24 }
  0xad   :  { %v1295_v38 = vmul.f32 %v1215_v31, %v1165_v35  ;;  %1785 = vmatmul.msk.bf16.vlgmr.msrb.gmra.mxu3 %vm637_vm0, %v1998_v24 }
  0xae   :  { %v1296_v40 = vmul.f32 %v1216_v34, %v1166_v36 }
  0xaf   :  { %v1339_v41 = vsel %vm1331_vm1, %v1295_v38, 0.0  ;;  %v728_v42 = vpop.f32.mrf.mxu2  ;;  %v170_v38 = vperm.slane %v148_v4, 5 }
  0xb0   :  { %v1340_v43 = vadd.f32 %v1339_v41, %v1338_v29  ;;  %v1341_v44 = vsel %vm1331_vm1, %v1296_v40, 0.0  ;;  %v729_v45 = vadd.f32 %v728_v42, %v163_v37  ;;  %v741_v47 = vpop.f32.mrf.mxu3  ;;  %v704_v48 = vpop.f32.mrf.mxu0  ;;  %v1222_v41 = vperm.slane %v2108_v12, 3 }
  0xb1   :  { %v742_v49 = vadd.f32 %v741_v47, %v164_v39  ;;  %v717_v51 = vpop.f32.mrf.mxu1  ;;  %v171_v42 = vperm.slane %v148_v4, 6  ;;  %v2117_v48 = vld [vmem:[#allocation5 + $0x10] sm:$0xff] }
  0xb2   :  { %v1342_v52 = vadd.f32 %v1341_v44, %v1340_v43  ;;  %v1167_v24 = vmax.f32 %v729_v45, 0.0 }
  0xb3   :  { %v1168_v54 = vmax.f32 %v742_v49, 0.0 }
  0xb4   :  { %v1297_v53 = vmul.f32 %v1217_v46, %v1167_v24  ;;  %v1223_v46 = vperm.slane %v2108_v12, 4  ;;  %v172_v24 = vperm.slane %v148_v4, 7 }
  0xb5   :  { %v1298_v56 = vmul.f32 %v1218_v50, %v1168_v54 }
  0xb6   :  { %v1343_v57 = vsel %vm1331_vm1, %v1297_v53, 0.0 }
  0xb7   :  { %v1344_v58 = vadd.f32 %v1343_v57, %v1342_v52  ;;  %v1345_v59 = vsel %vm1331_vm1, %v1298_v56, 0.0  ;;  %v730_v60 = vpop.f32.mrf.mxu2 }
  0xb8   :  { %v743_v61 = vpop.f32.mrf.mxu3  ;;  %v754_v62 = vpop.f32.mrf.mxu0  ;;  %v1224_v60 = vperm.slane %v2108_v12, 5 }
  0xb9   :  { %v1346_v63 = vadd.f32 %v1345_v59, %v1344_v58  ;;  %v767_v0 = vpop.f32.mrf.mxu1  ;;  %v755_v10 = vadd.f32 %v754_v62, %v165_v9  ;;  %v173_v61 = vperm.slane %v2117_v48, 0 }
  0xba   :  { %v768_v20 = vadd.f32 %v767_v0, %v166_v11  ;;  %v1226_v11 = vperm.slane %v2108_v12, 7 }
  0xbb   :  { %v1169_v18 = vmax.f32 %v755_v10, 0.0 }
  0xbc   :  { %v1170_v25 = vmax.f32 %v768_v20, 0.0 }
  0xbd   :  { %v1299_v23 = vmul.f32 %v1219_v19, %v1169_v18 }
  0xbe   :  { %v1300_v36 = vmul.f32 %v1220_v26, %v1170_v25  ;;  %v176_v26 = vperm.slane %v2117_v48, 3 }
  0xbf   :  { %v780_v1 = vpop.f32.mrf.mxu2  ;;  %v1347_v35 = vsel %vm1331_vm1, %v1299_v23, 0.0 }
  0xc0   :  { %v793_v2 = vpop.f32.mrf.mxu3  ;;  %v756_v3 = vpop.f32.mrf.mxu0  ;;  %v781_v21 = vadd.f32 %v780_v1, %v167_v14  ;;  %v1348_v43 = vadd.f32 %v1347_v35, %v1346_v63  ;;  %v1349_v44 = vsel %vm1331_vm1, %v1300_v36, 0.0  ;;  %v1225_v1 = vperm.slane %v2108_v12, 6 }
  0xc1   :  { %v769_v55 = vpop.f32.mrf.mxu1  ;;  %v794_v31 = vadd.f32 %v793_v2, %v168_v22 }
  0xc2   :  { %v1171_v29 = vmax.f32 %v781_v21, 0.0  ;;  %v1350_v56 = vadd.f32 %v1349_v44, %v1348_v43  ;;  %v178_v43 = vperm.slane %v2117_v48, 5 }
  0xc3   :  { %v1172_v40 = vmax.f32 %v794_v31, 0.0 }
  0xc4   :  { %v1301_v39 = vmul.f32 %v1221_v30, %v1171_v29  ;;  %v177_v30 = vperm.slane %v2117_v48, 4 }
  0xc5   :  { %v1302_v51 = vmul.f32 %v1222_v41, %v1172_v40 }
  0xc6   :  { %v1351_v50 = vsel %vm1331_vm1, %v1301_v39, 0.0 }
  0xc7   :  { %v782_v5 = vpop.f32.mrf.mxu2  ;;  %v1352_v62 = vadd.f32 %v1351_v50, %v1350_v56  ;;  %v1353_v63 = vsel %vm1331_vm1, %v1302_v51, 0.0  ;;  %v2144_v56 = vld [vmem:[#allocation5 + $0x18] sm:$0xff] }
  0xc8   :  { %v795_v6 = vpop.f32.mrf.mxu3  ;;  %v806_v7 = vpop.f32.mrf.mxu0  ;;  %v174_v5 = vperm.slane %v2117_v48, 1 }
  0xc9   :  { %v819_v8 = vpop.f32.mrf.mxu1  ;;  %v807_v37 = vadd.f32 %v806_v7, %v169_v27  ;;  %v1354_v6 = vadd.f32 %v1353_v63, %v1352_v62  ;;  %v2126_v7 = vld [vmem:[#allocation7 + $0x10] sm:$0xff] }
  0xca   :  { %v820_v47 = vadd.f32 %v819_v8, %v170_v38  ;;  %v1227_v20 = vperm.slane %v2126_v7, 0  ;;  %v1228_v29 = vperm.slane %v2126_v7, 1 }
  0xcb   :  { %v1173_v45 = vmax.f32 %v807_v37, 0.0 }
  0xcc   :  { %v1174_v59 = vmax.f32 %v820_v47, 0.0  ;;  %v1230_v47 = vperm.slane %v2126_v7, 3 }
  0xcd   :  { %v1303_v58 = vmul.f32 %v1223_v46, %v1173_v45 }
  0xce   :  { %v1304_v55 = vmul.f32 %v1224_v60, %v1174_v59  ;;  %v180_v60 = vperm.slane %v2117_v48, 7 }
  0xcf   :  { %v832_v13 = vpop.f32.mrf.mxu2  ;;  %v1355_v3 = vsel %vm1331_vm1, %v1303_v58, 0.0 }
  0xd0   :  { %v845_v15 = vpop.f32.mrf.mxu3  ;;  %v808_v16 = vpop.f32.mrf.mxu0  ;;  %v833_v52 = vadd.f32 %v832_v13, %v171_v42  ;;  %v175_v13 = vperm.slane %v2117_v48, 2  ;;  %v1357_v18 = vsel %vm1331_vm1, %v1304_v55, 0.0  ;;  %v181_v55 = vperm.slane %v2144_v56, 0 }
  0xd1   :  { %v821_v17 = vpop.f32.mrf.mxu1  ;;  %v846_v2 = vadd.f32 %v845_v15, %v172_v24  ;;  %v1231_v24 = vperm.slane %v2126_v7, 4 }
  0xd2   :  { %v1175_v0 = vmax.f32 %v833_v52, 0.0  ;;  %v1356_v17 = vadd.f32 %v1355_v3, %v1354_v6  ;;  %v1232_v3 = vperm.slane %v2126_v7, 5 }
  0xd3   :  { %v1176_v10 = vmax.f32 %v846_v2, 0.0 }
  0xd4   :  { %v1305_v9 = vmul.f32 %v1225_v1, %v1175_v0  ;;  %v1358_v27 = vadd.f32 %v1357_v18, %v1356_v17 }
  0xd5   :  { %v1306_v23 = vmul.f32 %v1226_v11, %v1176_v10 }
  0xd6   :  { %v1359_v22 = vsel %vm1331_vm1, %v1305_v9, 0.0 }
  0xd7   :  { %v834_v28 = vpop.f32.mrf.mxu2  ;;  %v1360_v31 = vadd.f32 %v1359_v22, %v1358_v27 }
  0xd8   :  { %v847_v32 = vpop.f32.mrf.mxu3  ;;  %v858_v33 = vpop.f32.mrf.mxu0 }
  0xd9   :  { %v871_v34 = vpop.f32.mrf.mxu1  ;;  %v859_v4 = vadd.f32 %v858_v33, %v173_v61  ;;  %v1361_v33 = vsel %vm1331_vm1, %v1306_v23, 0.0 }
  0xda   :  { %v872_v21 = vadd.f32 %v871_v34, %v174_v5  ;;  %v1229_v34 = vperm.slane %v2126_v7, 2  ;;  %v1362_v44 = vadd.f32 %v1361_v33, %v1360_v31 }
  0xdb   :  { %v1177_v19 = vmax.f32 %v859_v4, 0.0 }
  0xdc   :  { %v1178_v28 = vmax.f32 %v872_v21, 0.0 }
  0xdd   :  { %v1307_v12 = vmul.f32 %v1227_v20, %v1177_v19  ;;  %v1234_v19 = vperm.slane %v2126_v7, 7  ;;  %v183_v20 = vperm.slane %v2144_v56, 2 }
  0xde   :  { %v1308_v41 = vmul.f32 %v1228_v29, %v1178_v28 }
  0xdf   :  { %v884_v49 = vpop.f32.mrf.mxu2  ;;  %v1363_v40 = vsel %vm1331_vm1, %v1307_v12, 0.0 }
  0xe0   :  { %v897_v54 = vpop.f32.mrf.mxu3  ;;  %v860_v53 = vpop.f32.mrf.mxu0  ;;  %v885_v25 = vadd.f32 %v884_v49, %v175_v13  ;;  %v179_v49 = vperm.slane %v2117_v48, 6  ;;  %v1364_v50 = vadd.f32 %v1363_v40, %v1362_v44  ;;  %v1365_v51 = vsel %vm1331_vm1, %v1308_v41, 0.0 }
  0xe1   :  { %v873_v57 = vpop.f32.mrf.mxu1  ;;  %v898_v36 = vadd.f32 %v897_v54, %v176_v26  ;;  %v182_v13 = vperm.slane %v2144_v56, 1 }
  0xe2   :  { %v1179_v35 = vmax.f32 %v885_v25, 0.0  ;;  %v1366_v63 = vadd.f32 %v1365_v51, %v1364_v50  ;;  %v186_v50 = vperm.slane %v2144_v56, 5 }
  0xe3   :  { %v1180_v46 = vmax.f32 %v898_v36, 0.0  ;;  %v185_v36 = vperm.slane %v2144_v56, 4 }
  0xe4   :  { %v1309_v45 = vmul.f32 %v1229_v34, %v1179_v35 }
  0xe5   :  { %v1310_v58 = vmul.f32 %v1230_v47, %v1180_v46 }
  0xe6   :  { %v1367_v57 = vsel %vm1331_vm1, %v1309_v45, 0.0 }
  0xe7   :  { %v886_v8 = vpop.f32.mrf.mxu2  ;;  %v1368_v4 = vadd.f32 %v1367_v57, %v1366_v63  ;;  %v1369_v5 = vsel %vm1331_vm1, %v1310_v58, 0.0 }
  0xe8   :  { %v899_v14 = vpop.f32.mrf.mxu3  ;;  %v910_v16 = vpop.f32.mrf.mxu0  ;;  %v1233_v8 = vperm.slane %v2126_v7, 6 }
  0xe9   :  { %v923_v15 = vpop.f32.mrf.mxu1  ;;  %v911_v42 = vadd.f32 %v910_v16, %v177_v30  ;;  %v1370_v14 = vadd.f32 %v1369_v5, %v1368_v4  ;;  %v2154_v16 = vld [vmem:[#allocation7 + $0x18] sm:$0xff] }
  0xea   :  { %v924_v54 = vadd.f32 %v923_v15, %v178_v43  ;;  %v1235_v12 = vperm.slane %v2154_v16, 0  ;;  %v1236_v34 = vperm.slane %v2154_v16, 1  ;;  %v1237_v41 = vperm.slane %v2154_v16, 2 }
  0xeb   :  { %v1181_v52 = vmax.f32 %v911_v42, 0.0 }
  0xec   :  { %v1182_v2 = vmax.f32 %v924_v54, 0.0  ;;  %v1238_v54 = vperm.slane %v2154_v16, 3 }
  0xed   :  { %v1311_v1 = vmul.f32 %v1231_v24, %v1181_v52 }
  0xee   :  { %v1312_v48 = vmul.f32 %v1232_v3, %v1182_v2  ;;  %v188_v2 = vperm.slane %v2144_v56, 7 }
  0xef   :  { %v936_v32 = vpop.f32.mrf.mxu2  ;;  %v1371_v10 = vsel %vm1331_vm1, %v1311_v1, 0.0 }
  0xf0   :  { %v949_v37 = vpop.f32.mrf.mxu3  ;;  %v912_v38 = vpop.f32.mrf.mxu0  ;;  %v937_v59 = vadd.f32 %v936_v32, %v179_v49  ;;  %v1372_v23 = vadd.f32 %v1371_v10, %v1370_v14  ;;  %v1373_v26 = vsel %vm1331_vm1, %v1312_v48, 0.0  ;;  %v184_v32 = vperm.slane %v2144_v56, 3  ;;  %v2175_v10 = vld [vmem:[#allocation5 + $0x20] sm:$0xff] }
  0xf1   :  { %v925_v39 = vpop.f32.mrf.mxu1  ;;  %v950_v9 = vadd.f32 %v949_v37, %v180_v60  ;;  %v1239_v60 = vperm.slane %v2154_v16, 4  ;;  %v1241_v14 = vperm.slane %v2154_v16, 6 }
  0xf2   :  { %v1183_v6 = vmax.f32 %v937_v59, 0.0  ;;  %v1374_v33 = vadd.f32 %v1373_v26, %v1372_v23  ;;  %v1242_v26 = vperm.slane %v2154_v16, 7 }
  0xf3   :  { %v1184_v18 = vmax.f32 %v950_v9, 0.0  ;;  %v1240_v9 = vperm.slane %v2154_v16, 5 }
  0xf4   :  { %v1313_v15 = vmul.f32 %v1233_v8, %v1183_v6 }
  0xf5   :  { %v1314_v30 = vmul.f32 %v1234_v19, %v1184_v18  ;;  %v190_v19 = vperm.slane %v2175_v10, 1 }
  0xf6   :  { %v1375_v29 = vsel %vm1331_vm1, %v1313_v15, 0.0  ;;  %v189_v15 = vperm.slane %v2175_v10, 0 }
  0xf7   :  { %v938_v53 = vpop.f32.mrf.mxu2  ;;  %v1376_v37 = vadd.f32 %v1375_v29, %v1374_v33  ;;  %v1377_v39 = vsel %vm1331_vm1, %v1314_v30, 0.0 }
  0xf8   :  { %v951_v61 = vpop.f32.mrf.mxu3  ;;  %v962_v62 = vpop.f32.mrf.mxu0  ;;  %v187_v53 = vperm.slane %v2144_v56, 6 }
  0xf9   :  { %v975_v0 = vpop.f32.mrf.mxu1  ;;  %v963_v11 = vadd.f32 %v962_v62, %v181_v55  ;;  %v1378_v51 = vadd.f32 %v1377_v39, %v1376_v37 }
  0xfa   :  { %v976_v28 = vadd.f32 %v975_v0, %v182_v13 }
  0xfb   :  { %v1185_v27 = vmax.f32 %v963_v11, 0.0 }
  0xfc   :  { %v1186_v35 = vmax.f32 %v976_v28, 0.0 }
  0xfd   :  { %v1315_v7 = vmul.f32 %v1235_v12, %v1185_v27 }
  0xfe   :  { %v1316_v47 = vmul.f32 %v1236_v34, %v1186_v35 }
  0xff   :  { %v988_v17 = vpop.f32.mrf.mxu2  ;;  %v1379_v46 = vsel %vm1331_vm1, %v1315_v7, 0.0 }
 0x100   :  { %v1001_v21 = vpop.f32.mrf.mxu3  ;;  %v964_v22 = vpop.f32.mrf.mxu0  ;;  %v989_v31 = vadd.f32 %v988_v17, %v183_v20  ;;  %v1380_v57 = vadd.f32 %v1379_v46, %v1378_v51  ;;  %v1381_v58 = vsel %vm1331_vm1, %v1316_v47, 0.0 }
 0x101   :  { %v977_v25 = vpop.f32.mrf.mxu1  ;;  %v1002_v42 = vadd.f32 %v1001_v21, %v184_v32  ;;  %v2182_v22 = vld [vmem:[#allocation7 + $0x20] sm:$0xff] }
 0x102   :  { %v1187_v40 = vmax.f32 %v989_v31, 0.0  ;;  %v1382_v4 = vadd.f32 %v1381_v58, %v1380_v57  ;;  %v1243_v32 = vperm.slane %v2182_v22, 0  ;;  %v1246_v58 = vperm.slane %v2182_v22, 3 }
 0x103   :  { %v1188_v24 = vmax.f32 %v1002_v42, 0.0 }
 0x104   :  { %v1317_v52 = vmul.f32 %v1237_v41, %v1187_v40  ;;  %v1244_v40 = vperm.slane %v2182_v22, 1 }
 0x105   :  { %v1318_v0 = vmul.f32 %v1238_v54, %v1188_v24 }
 0x106   :  { %v1383_v63 = vsel %vm1331_vm1, %v1317_v52, 0.0 }
 0x107   :  { %v990_v38 = vpop.f32.mrf.mxu2  ;;  %v1384_v48 = vadd.f32 %v1383_v63, %v1382_v4  ;;  %v1385_v11 = vsel %vm1331_vm1, %v1318_v0, 0.0 }
 0x108   :  { %v1003_v43 = vpop.f32.mrf.mxu3  ;;  %v1014_v44 = vpop.f32.mrf.mxu0  ;;  %v192_v38 = vperm.slane %v2175_v10, 3 }
 0x109   :  { %v1027_v45 = vpop.f32.mrf.mxu1  ;;  %v1015_v49 = vadd.f32 %v1014_v44, %v185_v36  ;;  %v1386_v20 = vadd.f32 %v1385_v11, %v1384_v48  ;;  %v191_v36 = vperm.slane %v2175_v10, 2 }
 0x10a   :  { %v1028_v61 = vadd.f32 %v1027_v45, %v186_v50  ;;  %v1245_v45 = vperm.slane %v2182_v22, 2 }
 0x10b   :  { %v1189_v59 = vmax.f32 %v1015_v49, 0.0 }
 0x10c   :  { %v1190_v8 = vmax.f32 %v1028_v61, 0.0 }
 0x10d   :  { %v1319_v6 = vmul.f32 %v1239_v60, %v1189_v59  ;;  %v193_v60 = vperm.slane %v2175_v10, 4 }
 0x10e   :  { %v1320_v18 = vmul.f32 %v1240_v9, %v1190_v8  ;;  %v1248_v9 = vperm.slane %v2182_v22, 5 }
 0x10f   :  { %v1040_v62 = vpop.f32.mrf.mxu2  ;;  %v1387_v56 = vsel %vm1331_vm1, %v1319_v6, 0.0 }
 0x110   :  { %v1041_v1 = vadd.f32 %v1040_v62, %v187_v53  ;;  %v1053_v3 = vpop.f32.mrf.mxu3  ;;  %v1016_v55 = vpop.f32.mrf.mxu0  ;;  %v1388_v28 = vadd.f32 %v1387_v56, %v1386_v20  ;;  %v1389_v31 = vsel %vm1331_vm1, %v1320_v18, 0.0  ;;  %v194_v62 = vperm.slane %v2175_v10, 5 }
 0x111   :  { %v1029_v5 = vpop.f32.mrf.mxu1  ;;  %v1054_v17 = vadd.f32 %v1053_v3, %v188_v2  ;;  %v196_v56 = vperm.slane %v2175_v10, 7 }
 0x112   :  { %v1191_v13 = vmax.f32 %v1041_v1, 0.0  ;;  %v1390_v37 = vadd.f32 %v1389_v31, %v1388_v28  ;;  %v1247_v5 = vperm.slane %v2182_v22, 4 }
 0x113   :  { %v1192_v25 = vmax.f32 %v1054_v17, 0.0  ;;  %v195_v17 = vperm.slane %v2175_v10, 6 }
 0x114   :  { %v1321_v23 = vmul.f32 %v1241_v14, %v1191_v13 }
 0x115   :  { %v1322_v34 = vmul.f32 %v1242_v26, %v1192_v25  ;;  %v1249_v25 = vperm.slane %v2182_v22, 6 }
 0x116   :  { %v1391_v35 = vsel %vm1331_vm1, %v1321_v23, 0.0 }
 0x117   :  { %v1042_v21 = vpop.f32.mrf.mxu2  ;;  %v1392_v41 = vadd.f32 %v1391_v35, %v1390_v37  ;;  %v1393_v43 = vsel %vm1331_vm1, %v1322_v34, 0.0 }
 0x118   :  { %v1055_v27 = vpop.f32.mrf.mxu3  ;;  %v1066_v12 = vpop.f32.mrf.mxu0 }
 0x119   :  { %v1067_v29 = vadd.f32 %v1066_v12, %v189_v15  ;;  %v1079_v30 = vpop.f32.mrf.mxu1  ;;  %v1394_v54 = vadd.f32 %v1393_v43, %v1392_v41 }
 0x11a   :  { %v1080_v33 = vadd.f32 %v1079_v30, %v190_v19 }
 0x11b   :  { %v1193_v7 = vmax.f32 %v1067_v29, 0.0  ;;  %v1250_v29 = vperm.slane %v2182_v22, 7 }
 0x11c   :  { %v1194_v39 = vmax.f32 %v1080_v33, 0.0 }
 0x11d   :  { %v1323_v16 = vmul.f32 %v1243_v32, %v1193_v7 }
 0x11e   :  { %v1324_v52 = vmul.f32 %v1244_v40, %v1194_v39  ;;  %v1871_v40 = vld [vmem:[#allocation2] ss:$0 sm:$0xff] }
 0x11f   :  { %v1092_v42 = vpop.f32.mrf.mxu2  ;;  %v1395_v51 = vsel %vm1331_vm1, %v1323_v16, 0.0 }
 0x120   :  { %v1093_v44 = vadd.f32 %v1092_v42, %v191_v36  ;;  %v1105_v46 = vpop.f32.mrf.mxu3  ;;  %v1068_v47 = vpop.f32.mrf.mxu0  ;;  %v1396_v59 = vadd.f32 %v1395_v51, %v1394_v54  ;;  %v1397_v61 = vsel %vm1331_vm1, %v1324_v52, 0.0 }
 0x121   :  { %v1106_v49 = vadd.f32 %v1105_v46, %v192_v38  ;;  %v1081_v50 = vpop.f32.mrf.mxu1 }
 0x122   :  { %v1195_v24 = vmax.f32 %v1093_v44, 0.0  ;;  %v1398_v55 = vadd.f32 %v1397_v61, %v1396_v59 }
 0x123   :  { %v1196_v57 = vmax.f32 %v1106_v49, 0.0 }
 0x124   :  { %v1325_v53 = vmul.f32 %v1245_v45, %v1195_v24 }
 0x125   :  { %v1326_v1 = vmul.f32 %v1246_v58, %v1196_v57 }
 0x126   :  { %v1399_v0 = vsel %vm1331_vm1, %v1325_v53, 0.0 }
 0x127   :  { %v1094_v63 = vpop.f32.mrf.mxu2  ;;  %v1400_v48 = vadd.f32 %v1399_v0, %v1398_v55  ;;  %v1401_v13 = vsel %vm1331_vm1, %v1326_v1, 0.0 }
 0x128   :  { %v1107_v2 = vpop.f32.mrf.mxu3  ;;  %v1118_v3 = vpop.f32.mrf.mxu0 }
 0x129   :  { %v1119_v4 = vadd.f32 %v1118_v3, %v193_v60  ;;  %v1131_v6 = vpop.f32.mrf.mxu1  ;;  %v1402_v19 = vadd.f32 %v1401_v13, %v1400_v48 }
 0x12a   :  { %v1132_v8 = vadd.f32 %v1131_v6, %v194_v62 }
 0x12b   :  { %v1197_v11 = vmax.f32 %v1119_v4, 0.0 }
 0x12c   :  { %v1198_v14 = vmax.f32 %v1132_v8, 0.0 }
 0x12d   :  { %v1327_v15 = vmul.f32 %v1247_v5, %v1197_v11 }
 0x12e   :  { %v1328_v18 = vmul.f32 %v1248_v9, %v1198_v14 }
 0x12f   :  { %v1403_v20 = vsel %vm1331_vm1, %v1327_v15, 0.0  ;;  %v1144_v21 = vpop.f32.mrf.mxu2 }
 0x130   :  { %v1145_v23 = vadd.f32 %v1144_v21, %v195_v17  ;;  %v1157_v26 = vpop.f32.mrf.mxu3  ;;  %v1120_v27 = vpop.f32.mrf.mxu0  ;;  %v1404_v30 = vadd.f32 %v1403_v20, %v1402_v19  ;;  %v1405_v32 = vsel %vm1331_vm1, %v1328_v18, 0.0 }
 0x131   :  { %v1158_v12 = vadd.f32 %v1157_v26, %v196_v56  ;;  %v1133_v28 = vpop.f32.mrf.mxu1 }
 0x132   :  { %v1199_v31 = vmax.f32 %v1145_v23, 0.0  ;;  %v1406_v35 = vadd.f32 %v1405_v32, %v1404_v30 }
 0x133   :  { %v1200_v33 = vmax.f32 %v1158_v12, 0.0 }
 0x134   :  { %v1329_v10 = vmul.f32 %v1249_v25, %v1199_v31 }
 0x135   :  { %v1330_v7 = vmul.f32 %v1250_v29, %v1200_v33 }
 0x136   :  { %v1407_v34 = vsel %vm1331_vm1, %v1329_v10, 0.0 }
 0x137   :  { %v1146_v36 = vpop.f32.mrf.mxu2  ;;  %v1408_v37 = vadd.f32 %v1407_v34, %v1406_v35  ;;  %v1409_v38 = vsel %vm1331_vm1, %v1330_v7, 0.0 }
 0x138   :  { %v1159_v16 = vpop.f32.mrf.mxu3 }
 0x139   :  { %v1410_v39 = vadd.f32 %v1409_v38, %v1408_v37 }
 0x13b   :  { %1411 = vadd.xlane.f32.xlu0 %v1410_v39 }
 0x1ae   :  { %v1412_v41 = vpop.xlane.xlu0 %1411 }
 0x1af   :  { %v1417_v22 = vadd.f32 %v1871_v40, %v1412_v41 }
 0x1b1   :  { %1419 = vst.msk [vmem:[%s2218_s5] sm:$0x3] %vm1418_vm2, %v1417_v22 }
 0x1b2   :  { %1424 = vsyncpa [#allocation4], 1 }
 0x1b3   :  { %1425 = vsyncpa [#allocation6], 1 }

</bundles_post_ra>
